<compile_context>
chip_gen: v5e
topology: v5e:2x2
jax: 0.10.0
libtpu: 0.0.40
codegen_flags: <defaults>
</compile_context>

<pallas_src>
import math

import jax
import jax.numpy as jnp
from jax import lax
from jax.experimental import pallas as pl
from jax.experimental.pallas import tpu as pltpu

# ---- problem sizes (small, consistent with the module) ----
B = 2         # batch
S = 8         # sequence length
H = 4         # number of heads
D_K = 8       # per-head dim
D = H * D_K   # d_model = 32

OUT_W = B * D          # 64 lanes of the packed output: fc output
ATTN_W = B * H * S     # 64 lanes of the packed output: attention probs
PACK_W = OUT_W + ATTN_W  # 128 lanes -> single unmasked full-width store


def mha_kernel(x_ref, w_qkv_ref, w_fc_ref, packed_ref):
    x = x_ref[...]            # (B*S, 3D)  [q | k | v] along features
    w_qkv = w_qkv_ref[...]    # (3D, 3D)   blockdiag(Wq^T, Wk^T, Wv^T)  (in, out)
    w_fc = w_fc_ref[...]      # (D, D)     Wfc^T                        (in, out)

    # Fused Q/K/V projection: one MXU matmul, no transposes.
    qkv = jnp.dot(x, w_qkv, preferred_element_type=jnp.float32)   # (B*S, 3D)
    # TODO(synk): at production wav2vec2 sizes (D=768, long S) cast matmul
    # operands to bf16 (keep f32 accumulation) and tile the KV axis
    # flash-attention style (v7x has only 64 MiB VMEM); at these toy sizes
    # everything fits in a fraction of one MXU pass, so f32 keeps tolerances.

    scale = 1.0 / math.sqrt(D_K)
    out_cols = []
    attn_cols = []
    for b in range(B):                      # static unroll (B*H = 8 heads)
        r0 = b * S
        out_b = jnp.zeros((S, D), jnp.float32)
        for h in range(H):
            c0 = h * D_K
            qh = qkv[r0:r0 + S, c0:c0 + D_K]                      # (S, d_k)
            kh = qkv[r0:r0 + S, D + c0:D + c0 + D_K]              # (S, d_k)
            vh = qkv[r0:r0 + S, 2 * D + c0:2 * D + c0 + D_K]      # (S, d_k)

            # scores = qh @ kh^T without materializing a transpose
            scores = lax.dot_general(
                qh, kh, dimension_numbers=(((1,), (1,)), ((), ())),
                preferred_element_type=jnp.float32) * scale        # (S, S)
            # numerically stable softmax; reciprocal goes to the EUP slot
            scores = scores - jnp.max(scores, axis=-1, keepdims=True)
            e = jnp.exp(scores)
            p = e * pl.reciprocal(jnp.sum(e, axis=-1, keepdims=True),
                                  approx=False)                    # (S, S)
            # TODO(synk): dropout on p is identity (eval mode) and only the
            # mask=None path is implemented (masked_fill branch not exercised).
            # TODO(synk): make the attention-prob output optional for
            # inference-only callers (halves the kernel's store traffic).
            attn_cols.append(p)

            head = jnp.dot(p, vh, preferred_element_type=jnp.float32)  # (S, d_k)
            # Accumulate the final projection per head -> no head concat.
            out_b = out_b + jnp.dot(head, w_fc[c0:c0 + D_K, :],
                                    preferred_element_type=jnp.float32)
        out_cols.append(out_b)

    # Single lane-dense store: (S, 128) is one full f32 vreg width per row.
    packed_ref[...] = jnp.concatenate(out_cols + attn_cols, axis=1)


@jax.jit
def multihead_attention(q, k, v, w_q, w_k, w_v, w_fc):
    """q, k, v: (B, S, D) float32; weights: (D, D) in nn.Linear (out,in) layout.
    Returns (output (B, S, D), attn (B, H, S, S)) like the PyTorch module."""
    # Fold batch into rows.
    q2 = q.reshape(B * S, D)
    k2 = k.reshape(B * S, D)
    v2 = v.reshape(B * S, D)
    x_cat = jnp.concatenate([q2, k2, v2], axis=1)              # (B*S, 3D)

    # Pre-transposed, block-diagonal fused QKV weight (built once, wrapper-side).
    w_qkv = jnp.zeros((3 * D, 3 * D), jnp.float32)
    w_qkv = w_qkv.at[0:D, 0:D].set(w_q.T)
    w_qkv = w_qkv.at[D:2 * D, D:2 * D].set(w_k.T)
    w_qkv = w_qkv.at[2 * D:, 2 * D:].set(w_v.T)
    w_fc_t = w_fc.T                                            # (in, out)

    packed = pl.pallas_call(
        mha_kernel,
        out_shape=jax.ShapeDtypeStruct((S, PACK_W), jnp.float32),
        in_specs=[pl.BlockSpec(memory_space=pltpu.MemorySpace.VMEM)] * 3,
        out_specs=pl.BlockSpec(memory_space=pltpu.MemorySpace.VMEM),
    )(x_cat, w_qkv, w_fc_t)

    # Unpack the lane-dense slab (cheap wrapper-side XLA reshapes/transposes).
    out = packed[:, :OUT_W].reshape(S, B, D).transpose(1, 0, 2)          # (B,S,D)
    attn = packed[:, OUT_W:].reshape(S, B, H, S).transpose(1, 2, 0, 3)   # (B,H,S,S)
    return out, attn


def reference(q, k, v, w_q, w_k, w_v, w_fc):
    """Plain-JAX reference reproducing the PyTorch forward (eval mode)."""
    def split_heads(x):  # (B, S, D) -> (B, H, S, d_k)
        return x.reshape(B, S, H, D_K).transpose(0, 2, 1, 3)
    Q = split_heads(q @ w_q.T)
    K = split_heads(k @ w_k.T)
    V = split_heads(v @ w_v.T)
    scores = jnp.einsum("bhqd,bhkd->bhqk", Q, K) / math.sqrt(D_K)
    p = jax.nn.softmax(scores, axis=-1)
    out = jnp.einsum("bhqk,bhkd->bhqd", p, V)
    out = out.transpose(0, 2, 1, 3).reshape(B, S, D)
    return out @ w_fc.T, p


if __name__ == "__main__":
    key = jax.random.PRNGKey(0)
    kq, kk, kv, k1, k2, k3, k4 = jax.random.split(key, 7)

    q = jax.random.normal(kq, (B, S, D), dtype=jnp.float32)
    k = jax.random.normal(kk, (B, S, D), dtype=jnp.float32)
    v = jax.random.normal(kv, (B, S, D), dtype=jnp.float32)

    # Deterministic weight init ~ PyTorch nn.Linear default (uniform +/- 1/sqrt(fan_in))
    bound = 1.0 / math.sqrt(D)
    w_q = jax.random.uniform(k1, (D, D), jnp.float32, -bound, bound)
    w_k = jax.random.uniform(k2, (D, D), jnp.float32, -bound, bound)
    w_v = jax.random.uniform(k3, (D, D), jnp.float32, -bound, bound)
    w_fc = jax.random.uniform(k4, (D, D), jnp.float32, -bound, bound)

    out, attn = multihead_attention(q, k, v, w_q, w_k, w_v, w_fc)
    jax.block_until_ready((out, attn))

    ref_out, ref_attn = reference(q, k, v, w_q, w_k, w_v, w_fc)
    assert jnp.allclose(out, ref_out, atol=1e-4, rtol=1e-4), "output mismatch"
    assert jnp.allclose(attn, ref_attn, atol=1e-5, rtol=1e-5), "attn mismatch"

    print("KERNEL_OK")
</pallas_src>

<mosaic_0001>
module attributes {stable_mosaic.version = 11 : i64} {
  func.func @mha_kernel(%arg0: memref<16x96xf32, #tpu.memory_space<vmem>>, %arg1: memref<96x96xf32, #tpu.memory_space<vmem>>, %arg2: memref<32x32xf32, #tpu.memory_space<vmem>>, %arg3: memref<8x128xf32, #tpu.memory_space<vmem>>) attributes {dimension_semantics = [], scalar_prefetch = 0 : i64, scratch_operands = 0 : i64, tpu.core_type = #tpu.core_type<tc>} {
    %c0 = arith.constant 0 : index
    %c0_0 = arith.constant 0 : index
    %0 = vector.load %arg0[%c0, %c0_0] : memref<16x96xf32, #tpu.memory_space<vmem>>, vector<16x96xf32>
    %c0_1 = arith.constant 0 : index
    %c0_2 = arith.constant 0 : index
    %1 = vector.load %arg1[%c0_1, %c0_2] : memref<96x96xf32, #tpu.memory_space<vmem>>, vector<96x96xf32>
    %c0_3 = arith.constant 0 : index
    %c0_4 = arith.constant 0 : index
    %2 = vector.load %arg2[%c0_3, %c0_4] : memref<32x32xf32, #tpu.memory_space<vmem>>, vector<32x32xf32>
    %cst = arith.constant dense<0.000000e+00> : vector<16x96xf32>
    %3 = tpu.matmul %0, %1, %cst {dimension_numbers = #tpu.dot_dimension_numbers<[1], [0], [0], [1], [0, 0, 1, 1], [], []>} : vector<16x96xf32>, vector<96x96xf32>, vector<16x96xf32> -> vector<16x96xf32>
    %cst_5 = arith.constant 0.000000e+00 : f32
    %4 = vector.broadcast %cst_5 : f32 to vector<8x32xf32>
    %5 = vector.extract_strided_slice %3 {offsets = [0, 0], sizes = [8, 8], strides = [1, 1]} : vector<16x96xf32> to vector<8x8xf32>
    %6 = vector.extract_strided_slice %3 {offsets = [0, 32], sizes = [8, 8], strides = [1, 1]} : vector<16x96xf32> to vector<8x8xf32>
    %7 = vector.extract_strided_slice %3 {offsets = [0, 64], sizes = [8, 8], strides = [1, 1]} : vector<16x96xf32> to vector<8x8xf32>
    %cst_6 = arith.constant dense<0.000000e+00> : vector<8x8xf32>
    %8 = tpu.matmul %5, %6, %cst_6 {dimension_numbers = #tpu.dot_dimension_numbers<[1], [1], [0], [0], [0, 0, 1, 0], [], []>} : vector<8x8xf32>, vector<8x8xf32>, vector<8x8xf32> -> vector<8x8xf32>
    %cst_7 = arith.constant 0.353553385 : f32
    %9 = vector.broadcast %cst_7 : f32 to vector<8x8xf32>
    %10 = arith.mulf %8, %9 : vector<8x8xf32>
    %cst_8 = arith.constant dense<0xFF800000> : vector<8xf32>
    %11 = vector.multi_reduction <maximumf>, %10, %cst_8 [1] : vector<8x8xf32> to vector<8xf32>
    %12 = vector.shape_cast %11 : vector<8xf32> to vector<8x1xf32>
    %13 = vector.broadcast %12 : vector<8x1xf32> to vector<8x8xf32>
    %14 = arith.subf %10, %13 : vector<8x8xf32>
    %15 = math.exp %14 : vector<8x8xf32>
    %cst_9 = arith.constant dense<0.000000e+00> : vector<8xf32>
    %16 = vector.multi_reduction <add>, %15, %cst_9 [1] : vector<8x8xf32> to vector<8xf32>
    %17 = vector.shape_cast %16 : vector<8xf32> to vector<8x1xf32>
    %18 = tpu.reciprocal %17 : vector<8x1xf32> -> vector<8x1xf32>
    %19 = vector.broadcast %18 : vector<8x1xf32> to vector<8x8xf32>
    %20 = arith.mulf %15, %19 : vector<8x8xf32>
    %cst_10 = arith.constant dense<0.000000e+00> : vector<8x8xf32>
    %21 = tpu.matmul %20, %7, %cst_10 {dimension_numbers = #tpu.dot_dimension_numbers<[1], [0], [0], [1], [0, 0, 1, 1], [], []>} : vector<8x8xf32>, vector<8x8xf32>, vector<8x8xf32> -> vector<8x8xf32>
    %22 = vector.extract_strided_slice %2 {offsets = [0, 0], sizes = [8, 32], strides = [1, 1]} : vector<32x32xf32> to vector<8x32xf32>
    %cst_11 = arith.constant dense<0.000000e+00> : vector<8x32xf32>
    %23 = tpu.matmul %21, %22, %cst_11 {dimension_numbers = #tpu.dot_dimension_numbers<[1], [0], [0], [1], [0, 0, 1, 1], [], []>} : vector<8x8xf32>, vector<8x32xf32>, vector<8x32xf32> -> vector<8x32xf32>
    %24 = arith.addf %4, %23 : vector<8x32xf32>
    %25 = vector.extract_strided_slice %3 {offsets = [0, 8], sizes = [8, 8], strides = [1, 1]} : vector<16x96xf32> to vector<8x8xf32>
    %26 = vector.extract_strided_slice %3 {offsets = [0, 40], sizes = [8, 8], strides = [1, 1]} : vector<16x96xf32> to vector<8x8xf32>
    %27 = vector.extract_strided_slice %3 {offsets = [0, 72], sizes = [8, 8], strides = [1, 1]} : vector<16x96xf32> to vector<8x8xf32>
    %cst_12 = arith.constant dense<0.000000e+00> : vector<8x8xf32>
    %28 = tpu.matmul %25, %26, %cst_12 {dimension_numbers = #tpu.dot_dimension_numbers<[1], [1], [0], [0], [0, 0, 1, 0], [], []>} : vector<8x8xf32>, vector<8x8xf32>, vector<8x8xf32> -> vector<8x8xf32>
    %cst_13 = arith.constant 0.353553385 : f32
    %29 = vector.broadcast %cst_13 : f32 to vector<8x8xf32>
    %30 = arith.mulf %28, %29 : vector<8x8xf32>
    %cst_14 = arith.constant dense<0xFF800000> : vector<8xf32>
    %31 = vector.multi_reduction <maximumf>, %30, %cst_14 [1] : vector<8x8xf32> to vector<8xf32>
    %32 = vector.shape_cast %31 : vector<8xf32> to vector<8x1xf32>
    %33 = vector.broadcast %32 : vector<8x1xf32> to vector<8x8xf32>
    %34 = arith.subf %30, %33 : vector<8x8xf32>
    %35 = math.exp %34 : vector<8x8xf32>
    %cst_15 = arith.constant dense<0.000000e+00> : vector<8xf32>
    %36 = vector.multi_reduction <add>, %35, %cst_15 [1] : vector<8x8xf32> to vector<8xf32>
    %37 = vector.shape_cast %36 : vector<8xf32> to vector<8x1xf32>
    %38 = tpu.reciprocal %37 : vector<8x1xf32> -> vector<8x1xf32>
    %39 = vector.broadcast %38 : vector<8x1xf32> to vector<8x8xf32>
    %40 = arith.mulf %35, %39 : vector<8x8xf32>
    %cst_16 = arith.constant dense<0.000000e+00> : vector<8x8xf32>
    %41 = tpu.matmul %40, %27, %cst_16 {dimension_numbers = #tpu.dot_dimension_numbers<[1], [0], [0], [1], [0, 0, 1, 1], [], []>} : vector<8x8xf32>, vector<8x8xf32>, vector<8x8xf32> -> vector<8x8xf32>
    %42 = vector.extract_strided_slice %2 {offsets = [8, 0], sizes = [8, 32], strides = [1, 1]} : vector<32x32xf32> to vector<8x32xf32>
    %cst_17 = arith.constant dense<0.000000e+00> : vector<8x32xf32>
    %43 = tpu.matmul %41, %42, %cst_17 {dimension_numbers = #tpu.dot_dimension_numbers<[1], [0], [0], [1], [0, 0, 1, 1], [], []>} : vector<8x8xf32>, vector<8x32xf32>, vector<8x32xf32> -> vector<8x32xf32>
    %44 = arith.addf %24, %43 : vector<8x32xf32>
    %45 = vector.extract_strided_slice %3 {offsets = [0, 16], sizes = [8, 8], strides = [1, 1]} : vector<16x96xf32> to vector<8x8xf32>
    %46 = vector.extract_strided_slice %3 {offsets = [0, 48], sizes = [8, 8], strides = [1, 1]} : vector<16x96xf32> to vector<8x8xf32>
    %47 = vector.extract_strided_slice %3 {offsets = [0, 80], sizes = [8, 8], strides = [1, 1]} : vector<16x96xf32> to vector<8x8xf32>
    %cst_18 = arith.constant dense<0.000000e+00> : vector<8x8xf32>
    %48 = tpu.matmul %45, %46, %cst_18 {dimension_numbers = #tpu.dot_dimension_numbers<[1], [1], [0], [0], [0, 0, 1, 0], [], []>} : vector<8x8xf32>, vector<8x8xf32>, vector<8x8xf32> -> vector<8x8xf32>
    %cst_19 = arith.constant 0.353553385 : f32
    %49 = vector.broadcast %cst_19 : f32 to vector<8x8xf32>
    %50 = arith.mulf %48, %49 : vector<8x8xf32>
    %cst_20 = arith.constant dense<0xFF800000> : vector<8xf32>
    %51 = vector.multi_reduction <maximumf>, %50, %cst_20 [1] : vector<8x8xf32> to vector<8xf32>
    %52 = vector.shape_cast %51 : vector<8xf32> to vector<8x1xf32>
    %53 = vector.broadcast %52 : vector<8x1xf32> to vector<8x8xf32>
    %54 = arith.subf %50, %53 : vector<8x8xf32>
    %55 = math.exp %54 : vector<8x8xf32>
    %cst_21 = arith.constant dense<0.000000e+00> : vector<8xf32>
    %56 = vector.multi_reduction <add>, %55, %cst_21 [1] : vector<8x8xf32> to vector<8xf32>
    %57 = vector.shape_cast %56 : vector<8xf32> to vector<8x1xf32>
    %58 = tpu.reciprocal %57 : vector<8x1xf32> -> vector<8x1xf32>
    %59 = vector.broadcast %58 : vector<8x1xf32> to vector<8x8xf32>
    %60 = arith.mulf %55, %59 : vector<8x8xf32>
    %cst_22 = arith.constant dense<0.000000e+00> : vector<8x8xf32>
    %61 = tpu.matmul %60, %47, %cst_22 {dimension_numbers = #tpu.dot_dimension_numbers<[1], [0], [0], [1], [0, 0, 1, 1], [], []>} : vector<8x8xf32>, vector<8x8xf32>, vector<8x8xf32> -> vector<8x8xf32>
    %62 = vector.extract_strided_slice %2 {offsets = [16, 0], sizes = [8, 32], strides = [1, 1]} : vector<32x32xf32> to vector<8x32xf32>
    %cst_23 = arith.constant dense<0.000000e+00> : vector<8x32xf32>
    %63 = tpu.matmul %61, %62, %cst_23 {dimension_numbers = #tpu.dot_dimension_numbers<[1], [0], [0], [1], [0, 0, 1, 1], [], []>} : vector<8x8xf32>, vector<8x32xf32>, vector<8x32xf32> -> vector<8x32xf32>
    %64 = arith.addf %44, %63 : vector<8x32xf32>
    %65 = vector.extract_strided_slice %3 {offsets = [0, 24], sizes = [8, 8], strides = [1, 1]} : vector<16x96xf32> to vector<8x8xf32>
    %66 = vector.extract_strided_slice %3 {offsets = [0, 56], sizes = [8, 8], strides = [1, 1]} : vector<16x96xf32> to vector<8x8xf32>
    %67 = vector.extract_strided_slice %3 {offsets = [0, 88], sizes = [8, 8], strides = [1, 1]} : vector<16x96xf32> to vector<8x8xf32>
    %cst_24 = arith.constant dense<0.000000e+00> : vector<8x8xf32>
    %68 = tpu.matmul %65, %66, %cst_24 {dimension_numbers = #tpu.dot_dimension_numbers<[1], [1], [0], [0], [0, 0, 1, 0], [], []>} : vector<8x8xf32>, vector<8x8xf32>, vector<8x8xf32> -> vector<8x8xf32>
    %cst_25 = arith.constant 0.353553385 : f32
    %69 = vector.broadcast %cst_25 : f32 to vector<8x8xf32>
    %70 = arith.mulf %68, %69 : vector<8x8xf32>
    %cst_26 = arith.constant dense<0xFF800000> : vector<8xf32>
    %71 = vector.multi_reduction <maximumf>, %70, %cst_26 [1] : vector<8x8xf32> to vector<8xf32>
    %72 = vector.shape_cast %71 : vector<8xf32> to vector<8x1xf32>
    %73 = vector.broadcast %72 : vector<8x1xf32> to vector<8x8xf32>
    %74 = arith.subf %70, %73 : vector<8x8xf32>
    %75 = math.exp %74 : vector<8x8xf32>
    %cst_27 = arith.constant dense<0.000000e+00> : vector<8xf32>
    %76 = vector.multi_reduction <add>, %75, %cst_27 [1] : vector<8x8xf32> to vector<8xf32>
    %77 = vector.shape_cast %76 : vector<8xf32> to vector<8x1xf32>
    %78 = tpu.reciprocal %77 : vector<8x1xf32> -> vector<8x1xf32>
    %79 = vector.broadcast %78 : vector<8x1xf32> to vector<8x8xf32>
    %80 = arith.mulf %75, %79 : vector<8x8xf32>
    %cst_28 = arith.constant dense<0.000000e+00> : vector<8x8xf32>
    %81 = tpu.matmul %80, %67, %cst_28 {dimension_numbers = #tpu.dot_dimension_numbers<[1], [0], [0], [1], [0, 0, 1, 1], [], []>} : vector<8x8xf32>, vector<8x8xf32>, vector<8x8xf32> -> vector<8x8xf32>
    %82 = vector.extract_strided_slice %2 {offsets = [24, 0], sizes = [8, 32], strides = [1, 1]} : vector<32x32xf32> to vector<8x32xf32>
    %cst_29 = arith.constant dense<0.000000e+00> : vector<8x32xf32>
    %83 = tpu.matmul %81, %82, %cst_29 {dimension_numbers = #tpu.dot_dimension_numbers<[1], [0], [0], [1], [0, 0, 1, 1], [], []>} : vector<8x8xf32>, vector<8x32xf32>, vector<8x32xf32> -> vector<8x32xf32>
    %84 = arith.addf %64, %83 : vector<8x32xf32>
    %cst_30 = arith.constant 0.000000e+00 : f32
    %85 = vector.broadcast %cst_30 : f32 to vector<8x32xf32>
    %86 = vector.extract_strided_slice %3 {offsets = [8, 0], sizes = [8, 8], strides = [1, 1]} : vector<16x96xf32> to vector<8x8xf32>
    %87 = vector.extract_strided_slice %3 {offsets = [8, 32], sizes = [8, 8], strides = [1, 1]} : vector<16x96xf32> to vector<8x8xf32>
    %88 = vector.extract_strided_slice %3 {offsets = [8, 64], sizes = [8, 8], strides = [1, 1]} : vector<16x96xf32> to vector<8x8xf32>
    %cst_31 = arith.constant dense<0.000000e+00> : vector<8x8xf32>
    %89 = tpu.matmul %86, %87, %cst_31 {dimension_numbers = #tpu.dot_dimension_numbers<[1], [1], [0], [0], [0, 0, 1, 0], [], []>} : vector<8x8xf32>, vector<8x8xf32>, vector<8x8xf32> -> vector<8x8xf32>
    %cst_32 = arith.constant 0.353553385 : f32
    %90 = vector.broadcast %cst_32 : f32 to vector<8x8xf32>
    %91 = arith.mulf %89, %90 : vector<8x8xf32>
    %cst_33 = arith.constant dense<0xFF800000> : vector<8xf32>
    %92 = vector.multi_reduction <maximumf>, %91, %cst_33 [1] : vector<8x8xf32> to vector<8xf32>
    %93 = vector.shape_cast %92 : vector<8xf32> to vector<8x1xf32>
    %94 = vector.broadcast %93 : vector<8x1xf32> to vector<8x8xf32>
    %95 = arith.subf %91, %94 : vector<8x8xf32>
    %96 = math.exp %95 : vector<8x8xf32>
    %cst_34 = arith.constant dense<0.000000e+00> : vector<8xf32>
    %97 = vector.multi_reduction <add>, %96, %cst_34 [1] : vector<8x8xf32> to vector<8xf32>
    %98 = vector.shape_cast %97 : vector<8xf32> to vector<8x1xf32>
    %99 = tpu.reciprocal %98 : vector<8x1xf32> -> vector<8x1xf32>
    %100 = vector.broadcast %99 : vector<8x1xf32> to vector<8x8xf32>
    %101 = arith.mulf %96, %100 : vector<8x8xf32>
    %cst_35 = arith.constant dense<0.000000e+00> : vector<8x8xf32>
    %102 = tpu.matmul %101, %88, %cst_35 {dimension_numbers = #tpu.dot_dimension_numbers<[1], [0], [0], [1], [0, 0, 1, 1], [], []>} : vector<8x8xf32>, vector<8x8xf32>, vector<8x8xf32> -> vector<8x8xf32>
    %103 = vector.extract_strided_slice %2 {offsets = [0, 0], sizes = [8, 32], strides = [1, 1]} : vector<32x32xf32> to vector<8x32xf32>
    %cst_36 = arith.constant dense<0.000000e+00> : vector<8x32xf32>
    %104 = tpu.matmul %102, %103, %cst_36 {dimension_numbers = #tpu.dot_dimension_numbers<[1], [0], [0], [1], [0, 0, 1, 1], [], []>} : vector<8x8xf32>, vector<8x32xf32>, vector<8x32xf32> -> vector<8x32xf32>
    %105 = arith.addf %85, %104 : vector<8x32xf32>
    %106 = vector.extract_strided_slice %3 {offsets = [8, 8], sizes = [8, 8], strides = [1, 1]} : vector<16x96xf32> to vector<8x8xf32>
    %107 = vector.extract_strided_slice %3 {offsets = [8, 40], sizes = [8, 8], strides = [1, 1]} : vector<16x96xf32> to vector<8x8xf32>
    %108 = vector.extract_strided_slice %3 {offsets = [8, 72], sizes = [8, 8], strides = [1, 1]} : vector<16x96xf32> to vector<8x8xf32>
    %cst_37 = arith.constant dense<0.000000e+00> : vector<8x8xf32>
    %109 = tpu.matmul %106, %107, %cst_37 {dimension_numbers = #tpu.dot_dimension_numbers<[1], [1], [0], [0], [0, 0, 1, 0], [], []>} : vector<8x8xf32>, vector<8x8xf32>, vector<8x8xf32> -> vector<8x8xf32>
    %cst_38 = arith.constant 0.353553385 : f32
    %110 = vector.broadcast %cst_38 : f32 to vector<8x8xf32>
    %111 = arith.mulf %109, %110 : vector<8x8xf32>
    %cst_39 = arith.constant dense<0xFF800000> : vector<8xf32>
    %112 = vector.multi_reduction <maximumf>, %111, %cst_39 [1] : vector<8x8xf32> to vector<8xf32>
    %113 = vector.shape_cast %112 : vector<8xf32> to vector<8x1xf32>
    %114 = vector.broadcast %113 : vector<8x1xf32> to vector<8x8xf32>
    %115 = arith.subf %111, %114 : vector<8x8xf32>
    %116 = math.exp %115 : vector<8x8xf32>
    %cst_40 = arith.constant dense<0.000000e+00> : vector<8xf32>
    %117 = vector.multi_reduction <add>, %116, %cst_40 [1] : vector<8x8xf32> to vector<8xf32>
    %118 = vector.shape_cast %117 : vector<8xf32> to vector<8x1xf32>
    %119 = tpu.reciprocal %118 : vector<8x1xf32> -> vector<8x1xf32>
    %120 = vector.broadcast %119 : vector<8x1xf32> to vector<8x8xf32>
    %121 = arith.mulf %116, %120 : vector<8x8xf32>
    %cst_41 = arith.constant dense<0.000000e+00> : vector<8x8xf32>
    %122 = tpu.matmul %121, %108, %cst_41 {dimension_numbers = #tpu.dot_dimension_numbers<[1], [0], [0], [1], [0, 0, 1, 1], [], []>} : vector<8x8xf32>, vector<8x8xf32>, vector<8x8xf32> -> vector<8x8xf32>
    %123 = vector.extract_strided_slice %2 {offsets = [8, 0], sizes = [8, 32], strides = [1, 1]} : vector<32x32xf32> to vector<8x32xf32>
    %cst_42 = arith.constant dense<0.000000e+00> : vector<8x32xf32>
    %124 = tpu.matmul %122, %123, %cst_42 {dimension_numbers = #tpu.dot_dimension_numbers<[1], [0], [0], [1], [0, 0, 1, 1], [], []>} : vector<8x8xf32>, vector<8x32xf32>, vector<8x32xf32> -> vector<8x32xf32>
    %125 = arith.addf %105, %124 : vector<8x32xf32>
    %126 = vector.extract_strided_slice %3 {offsets = [8, 16], sizes = [8, 8], strides = [1, 1]} : vector<16x96xf32> to vector<8x8xf32>
    %127 = vector.extract_strided_slice %3 {offsets = [8, 48], sizes = [8, 8], strides = [1, 1]} : vector<16x96xf32> to vector<8x8xf32>
    %128 = vector.extract_strided_slice %3 {offsets = [8, 80], sizes = [8, 8], strides = [1, 1]} : vector<16x96xf32> to vector<8x8xf32>
    %cst_43 = arith.constant dense<0.000000e+00> : vector<8x8xf32>
    %129 = tpu.matmul %126, %127, %cst_43 {dimension_numbers = #tpu.dot_dimension_numbers<[1], [1], [0], [0], [0, 0, 1, 0], [], []>} : vector<8x8xf32>, vector<8x8xf32>, vector<8x8xf32> -> vector<8x8xf32>
    %cst_44 = arith.constant 0.353553385 : f32
    %130 = vector.broadcast %cst_44 : f32 to vector<8x8xf32>
    %131 = arith.mulf %129, %130 : vector<8x8xf32>
    %cst_45 = arith.constant dense<0xFF800000> : vector<8xf32>
    %132 = vector.multi_reduction <maximumf>, %131, %cst_45 [1] : vector<8x8xf32> to vector<8xf32>
    %133 = vector.shape_cast %132 : vector<8xf32> to vector<8x1xf32>
    %134 = vector.broadcast %133 : vector<8x1xf32> to vector<8x8xf32>
    %135 = arith.subf %131, %134 : vector<8x8xf32>
    %136 = math.exp %135 : vector<8x8xf32>
    %cst_46 = arith.constant dense<0.000000e+00> : vector<8xf32>
    %137 = vector.multi_reduction <add>, %136, %cst_46 [1] : vector<8x8xf32> to vector<8xf32>
    %138 = vector.shape_cast %137 : vector<8xf32> to vector<8x1xf32>
    %139 = tpu.reciprocal %138 : vector<8x1xf32> -> vector<8x1xf32>
    %140 = vector.broadcast %139 : vector<8x1xf32> to vector<8x8xf32>
    %141 = arith.mulf %136, %140 : vector<8x8xf32>
    %cst_47 = arith.constant dense<0.000000e+00> : vector<8x8xf32>
    %142 = tpu.matmul %141, %128, %cst_47 {dimension_numbers = #tpu.dot_dimension_numbers<[1], [0], [0], [1], [0, 0, 1, 1], [], []>} : vector<8x8xf32>, vector<8x8xf32>, vector<8x8xf32> -> vector<8x8xf32>
    %143 = vector.extract_strided_slice %2 {offsets = [16, 0], sizes = [8, 32], strides = [1, 1]} : vector<32x32xf32> to vector<8x32xf32>
    %cst_48 = arith.constant dense<0.000000e+00> : vector<8x32xf32>
    %144 = tpu.matmul %142, %143, %cst_48 {dimension_numbers = #tpu.dot_dimension_numbers<[1], [0], [0], [1], [0, 0, 1, 1], [], []>} : vector<8x8xf32>, vector<8x32xf32>, vector<8x32xf32> -> vector<8x32xf32>
    %145 = arith.addf %125, %144 : vector<8x32xf32>
    %146 = vector.extract_strided_slice %3 {offsets = [8, 24], sizes = [8, 8], strides = [1, 1]} : vector<16x96xf32> to vector<8x8xf32>
    %147 = vector.extract_strided_slice %3 {offsets = [8, 56], sizes = [8, 8], strides = [1, 1]} : vector<16x96xf32> to vector<8x8xf32>
    %148 = vector.extract_strided_slice %3 {offsets = [8, 88], sizes = [8, 8], strides = [1, 1]} : vector<16x96xf32> to vector<8x8xf32>
    %cst_49 = arith.constant dense<0.000000e+00> : vector<8x8xf32>
    %149 = tpu.matmul %146, %147, %cst_49 {dimension_numbers = #tpu.dot_dimension_numbers<[1], [1], [0], [0], [0, 0, 1, 0], [], []>} : vector<8x8xf32>, vector<8x8xf32>, vector<8x8xf32> -> vector<8x8xf32>
    %cst_50 = arith.constant 0.353553385 : f32
    %150 = vector.broadcast %cst_50 : f32 to vector<8x8xf32>
    %151 = arith.mulf %149, %150 : vector<8x8xf32>
    %cst_51 = arith.constant dense<0xFF800000> : vector<8xf32>
    %152 = vector.multi_reduction <maximumf>, %151, %cst_51 [1] : vector<8x8xf32> to vector<8xf32>
    %153 = vector.shape_cast %152 : vector<8xf32> to vector<8x1xf32>
    %154 = vector.broadcast %153 : vector<8x1xf32> to vector<8x8xf32>
    %155 = arith.subf %151, %154 : vector<8x8xf32>
    %156 = math.exp %155 : vector<8x8xf32>
    %cst_52 = arith.constant dense<0.000000e+00> : vector<8xf32>
    %157 = vector.multi_reduction <add>, %156, %cst_52 [1] : vector<8x8xf32> to vector<8xf32>
    %158 = vector.shape_cast %157 : vector<8xf32> to vector<8x1xf32>
    %159 = tpu.reciprocal %158 : vector<8x1xf32> -> vector<8x1xf32>
    %160 = vector.broadcast %159 : vector<8x1xf32> to vector<8x8xf32>
    %161 = arith.mulf %156, %160 : vector<8x8xf32>
    %cst_53 = arith.constant dense<0.000000e+00> : vector<8x8xf32>
    %162 = tpu.matmul %161, %148, %cst_53 {dimension_numbers = #tpu.dot_dimension_numbers<[1], [0], [0], [1], [0, 0, 1, 1], [], []>} : vector<8x8xf32>, vector<8x8xf32>, vector<8x8xf32> -> vector<8x8xf32>
    %163 = vector.extract_strided_slice %2 {offsets = [24, 0], sizes = [8, 32], strides = [1, 1]} : vector<32x32xf32> to vector<8x32xf32>
    %cst_54 = arith.constant dense<0.000000e+00> : vector<8x32xf32>
    %164 = tpu.matmul %162, %163, %cst_54 {dimension_numbers = #tpu.dot_dimension_numbers<[1], [0], [0], [1], [0, 0, 1, 1], [], []>} : vector<8x8xf32>, vector<8x32xf32>, vector<8x32xf32> -> vector<8x32xf32>
    %165 = arith.addf %145, %164 : vector<8x32xf32>
    %166 = tpu.concatenate %84, %165, %20, %40, %60, %80, %101, %121, %141, %161 in 1 : vector<8x32xf32>, vector<8x32xf32>, vector<8x8xf32>, vector<8x8xf32>, vector<8x8xf32>, vector<8x8xf32>, vector<8x8xf32>, vector<8x8xf32>, vector<8x8xf32>, vector<8x8xf32> -> vector<8x128xf32>
    %c0_55 = arith.constant 0 : index
    %c0_56 = arith.constant 0 : index
    %167 = vector.load %arg3[%c0_55, %c0_56] : memref<8x128xf32, #tpu.memory_space<vmem>>, vector<8x128xf32>
    tpu.vector_store %arg3[%c0_55, %c0_56], %166 {strides = array<i32>} : memref<8x128xf32, #tpu.memory_space<vmem>>, vector<8x128xf32>,
    return
  }
}

</mosaic_0001>

<bundles_post_ra>
// kernel: multihead_attention.1
= control target key start
LH: loop header
LB: loop body
LE: loop exit
PB: predicated region body
PF: predicated region fallthrough
CT: control target
= control target key end

     0   :  { %vm32_vm0 = vcmask 785408   ;;  %s1009_s11 = smov 64   ;;  %s1010_s12 = smov 120   ;;  %vm65_vm1 = vcmask 64512   ;;  %s1253_s1 = inlined_call_operand.vmem [shape: f32[96,96], index: 1, kind: input, shape index: {}]   ;;  %s1254_s0 = inlined_call_operand.vmem [shape: f32[16,96], index: 0, kind: input, shape index: {}]   ;;  %s1255_s2 = inlined_call_operand.vmem [shape: f32[32,32], index: 2, kind: input, shape index: {}]   ;;  %s1256_s3 = inlined_call_operand.vmem [shape: f32[8,128], index: 3, kind: output, shape index: {}]  }
   0x1   :  { %v27_v0 = vld [vmem:[%s1253_s1 + $0x58] sm:$0xff]  ;;  %v26_v1 = vld [vmem:[%s1253_s1 + $0x50] sm:$0xff]  ;;  %v25_v2 = vld [vmem:[%s1253_s1 + $0x48] sm:$0xff]  ;;  %s1012_s13 = smov 56   ;;  %s1013_s14 = smov 88  }
   0x2   :  { %43 = vmatpush.msra.mxu0 %v27_v0  ;;  %v24_v3 = vld [vmem:[%s1253_s1 + $0x40] sm:$0xff]  ;;  %v23_v4 = vld [vmem:[%s1253_s1 + $0x38] sm:$0xff]  ;;  %v22_v5 = vld [vmem:[%s1253_s1 + $0x30] sm:$0xff]  ;;  %s1014_s17 = smov 112   ;;  %s1015_s18 = smov 80  }
   0x3   :  { %v21_v6 = vld [vmem:[%s1253_s1 + $0x28] sm:$0xff]  ;;  %v20_v7 = vld [vmem:[%s1253_s1 + $0x20] sm:$0xff]  ;;  %v19_v8 = vld [vmem:[%s1253_s1 + $0x18] sm:$0xff]  ;;  %s1017_s19 = smov 104   ;;  %s1018_s24 = smov 48  }
   0x4   :  { %44 = vmatpush.msra.mxu0 %v26_v1  ;;  %v18_v9 = vld [vmem:[%s1253_s1 + $0x10] sm:$0xff]  ;;  %v17_v10 = vld [vmem:[%s1253_s1 + $0x8] sm:$0xff]  ;;  %v16_v11 = vld [vmem:[%s1253_s1] sm:$0xff]  ;;  %s1011_s1 = smov 96   ;;  %s1019_s25 = smov 40  }
   0x5   :  { %v14_v12 = vld [vmem:[%s1254_s0] sm:$0xff]  ;;  %v15_v22 = vld [vmem:[%s1254_s0 + $0x8] sm:$0xff]  ;;  %s1016_s0 = smov 72  }
   0x6   :  { %45 = vmatpush.msra.mxu0 %v25_v2  ;;  %v1136_v2 = vld [vmem:[%s1255_s2] sm:$0xff] }
   0x8   :  { %46 = vmatpush.msra.mxu0 %v24_v3  ;;  %v29_v3 = vld [vmem:[%s1255_s2 + $0x8] sm:$0xff] }
   0xa   :  { %47 = vmatpush.msra.mxu0 %v23_v4 }
   0xc   :  { %48 = vmatpush.msra.mxu0 %v22_v5 }
   0xe   :  { %49 = vmatpush.msra.mxu0 %v21_v6 }
  0x10   :  { %50 = vmatpush.msra.mxu0 %v20_v7 }
  0x12   :  { %51 = vmatpush.msra.mxu0 %v19_v8 }
  0x14   :  { %52 = vmatpush.msra.mxu0 %v18_v9 }
  0x16   :  { %53 = vmatpush.msra.mxu0 %v17_v10 }
  0x18   :  { %54 = vmatpush.msra.mxu0 %v16_v11 }
  0x19   :  { %931 = vmatmul.msk.f32.vlgmr.msra.gmra.mxu0 %vm32_vm0, %v14_v12 }
  0x21   :  { %932 = vmatmul.msk.f32.gmra.mxu0 %vm32_vm0, %v15_v22 }
  0x96   :  { %v1081_v13 = vpop.f32.mrf.mxu0 }
  0x97   :  { %115 = vrot.lane.b32.xlu2 %v1081_v13, %s1009_s11  ;;  %141 = vrot.lane.b32.xlu1 %v1081_v13, %s1010_s12 }
  0x98   :  { %63 = vrot.lane.b32.xlu0 %v1081_v13, %s1011_s1 }
  0x9e   :  { %v1112_v36 = vpop.f32.mrf.mxu0 }
  0x9f   :  { %194 = vrot.lane.b32.xlu2 %v1081_v13, %s1012_s13 }
  0xa0   :  { %143 = vrot.lane.b32.xlu0 %v1081_v13, %s1013_s14 }
  0xf1   :  { %v116_v14 = vpop.permute.xlu2 %115 }
  0xf2   :  { %136 = vmatpush.msra.mxu2 %v116_v14 }
  0xf9   :  { %v195_v15 = vpop.permute.xlu2 %194 }
  0xfa   :  { %215 = vmatpush.msrb.mxu2 %v195_v15 }
 0x109   :  { %v142_v18 = vpop.permute.xlu1 %141 }
 0x10a   :  { %v64_v16 = vpop.permute.xlu0 %63 }
 0x10b   :  { %933 = vmatpush.xpose.msk.msra.mxu1 %vm65_vm1, %v64_v16 }
 0x10e   :  { %934 = vmatmul.msk.f32.vlgmr.msra.gmra.mxu1 %vm65_vm1, %v1081_v13 }
 0x10f   :  { %238 = vmatpush.msrb.mxu1 %v29_v3 }
 0x112   :  { %v144_v17 = vpop.permute.xlu0 %143 }
 0x113   :  { %936 = vmatpush.xpose.msk.msra.mxu3 %vm65_vm1, %v144_v17 }
 0x116   :  { %937 = vmatmul.msk.f32.vlgmr.msra.gmra.mxu3 %vm65_vm1, %v142_v18 }
 0x117   :  { %261 = vmatpush.msrb.mxu3 %v1136_v2 }
 0x18b   :  { %v87_v19 = vpop.f32.mrf.mxu1 }
 0x18c   :  { %v90_v20 = vmul.f32 0.35355338, %v87_v19 }
 0x18e   :  { %v91_v21 = vsel %vm65_vm1, %v90_v20, -inf }
 0x18f   :  { %92 = vmax.xlane.f32.xlu1 %v91_v21 }
 0x199   :  { %v166_v23 = vpop.f32.mrf.mxu3 }
 0x19a   :  { %v169_v24 = vmul.f32 0.35355338, %v166_v23 }
 0x19c   :  { %v170_v25 = vsel %vm65_vm1, %v169_v24, -inf }
 0x19d   :  { %171 = vmax.xlane.f32.xlu2 %v170_v25 }
 0x1a8   :  { %266 = vrot.lane.b32.xlu1 %v1081_v13, %s1014_s17 }
 0x1b5   :  { %268 = vrot.lane.b32.xlu2 %v1081_v13, %s1015_s18 }
 0x202   :  { %v93_v26 = vpop.xlane.xlu1 %92 }
 0x203   :  { %v94_v27 = vsub.f32 %v90_v20, %v93_v26 }
 0x205   :  { %v95_v28 = vmul.f32 1.442695, %v94_v27 }
 0x207   :  { %977 = vpow2.f32 %v95_v28 }
 0x20d   :  { %v978_v29 = vpop.eup %977 }
 0x20e   :  { %v97_v30 = vsel %vm65_vm1, %v978_v29, 0.0 }
 0x20f   :  { %98 = vadd.xlane.f32.xlu2 %v97_v30 }
 0x210   :  { %v172_v31 = vpop.xlane.xlu2 %171 }
 0x211   :  { %v173_v32 = vsub.f32 %v169_v24, %v172_v31 }
 0x213   :  { %v174_v33 = vmul.f32 1.442695, %v173_v32 }
 0x215   :  { %979 = vpow2.f32 %v174_v33 }
 0x218   :  { %v269_v37 = vpop.permute.xlu2 %268 }
 0x21a   :  { %v267_v0 = vpop.permute.xlu1 %266 }
 0x21b   :  { %v980_v34 = vpop.eup %979 }
 0x21c   :  { %v176_v35 = vsel %vm65_vm1, %v980_v34, 0.0 }
 0x21d   :  { %177 = vadd.xlane.f32.xlu0 %v176_v35 }
 0x227   :  { %371 = vrot.lane.b32.xlu2 %v1081_v13, %s1016_s0 }
 0x22f   :  { %473 = vrot.lane.b32.xlu2 %v1112_v36, %s1011_s1 }
 0x231   :  { %369 = vrot.lane.b32.xlu0 %v1081_v13, %s1017_s19 }
 0x282   :  { %v99_v38 = vpop.xlane.xlu2 %98 }
 0x283   :  { %981 = vrcp.f32 %v99_v38  ;;  %v111_v42 = vand.u32 2147483648, %v99_v38  ;;  %v109_v44 = vand.u32 2147483647, %v99_v38  ;;  %vm105_vm3 = vweird.f32 %v99_v38 }
 0x285   :  { %v112_v47 = vor.u32 1.1754944e-38, %v111_v42  ;;  %vm110_vm5 = vcmp.eq.f32.partialorder %v109_v44, 8.507059e+37 }
 0x289   :  { %v982_v39 = vpop.eup %981 }
 0x28a   :  { %v101_v40 = vmul.f32 %v982_v39, %v99_v38  ;;  %vm106_vm2 = vweird.f32 %v982_v39  ;;  %v372_v61 = vpop.permute.xlu2 %371 }
 0x28b   :  { %vm107_vm4 = vmor %vm105_vm3, %vm106_vm2 }
 0x28c   :  { %v102_v41 = vsub.f32 1.0, %v101_v40 }
 0x28e   :  { %v103_v43 = vmul.f32 %v982_v39, %v102_v41 }
 0x290   :  { %v178_v45 = vpop.xlane.xlu0 %177  ;;  %v104_v46 = vadd.f32 %v982_v39, %v103_v43 }
 0x291   :  { %983 = vrcp.f32 %v178_v45  ;;  %v190_v54 = vand.u32 2147483648, %v178_v45  ;;  %v188_v56 = vand.u32 2147483647, %v178_v45  ;;  %vm184_vm7 = vweird.f32 %v178_v45 }
 0x292   :  { %v108_v48 = vsel %vm107_vm4, %v982_v39, %v104_v46  ;;  %v474_v63 = vpop.permute.xlu2 %473  ;;  %v30_v46 = vld [vmem:[%s1255_s2 + $0x10] sm:$0xff] }
 0x293   :  { %v113_v49 = vsel %vm110_vm5, %v112_v47, %v108_v48  ;;  %v191_v58 = vor.u32 1.1754944e-38, %v190_v54  ;;  %vm189_vm9 = vcmp.eq.f32.partialorder %v188_v56, 8.507059e+37  ;;  %363 = vmatpush.msra.mxu3 %v30_v46 }
 0x294   :  { %v1118_v50 = vmul.f32 %v978_v29, %v113_v49 }
 0x296   :  { %935 = vmatmul.msk.f32.vlgmr.msra.gmra.mxu2 %vm65_vm1, %v1118_v50 }
 0x297   :  { %v984_v51 = vpop.eup %983  ;;  %941 = vmatpush.xpose.msk.msra.mxu2 %vm65_vm1, %v269_v37 }
 0x298   :  { %v180_v52 = vmul.f32 %v984_v51, %v178_v45  ;;  %vm185_vm6 = vweird.f32 %v984_v51 }
 0x299   :  { %vm186_vm8 = vmor %vm184_vm7, %vm185_vm6 }
 0x29a   :  { %v181_v53 = vsub.f32 1.0, %v180_v52 }
 0x29c   :  { %v182_v55 = vmul.f32 %v984_v51, %v181_v53 }
 0x29e   :  { %v183_v57 = vadd.f32 %v984_v51, %v182_v55 }
 0x2a0   :  { %v187_v59 = vsel %vm186_vm8, %v984_v51, %v183_v57 }
 0x2a1   :  { %v192_v60 = vsel %vm189_vm9, %v191_v58, %v187_v59 }
 0x2a2   :  { %v1123_v62 = vmul.f32 %v980_v34, %v192_v60 }
 0x2a3   :  { %v370_v1 = vpop.permute.xlu0 %369 }
 0x2a4   :  { %938 = vmatmul.msk.f32.vlgmr.msrb.gmra.mxu2 %vm65_vm1, %v1123_v62 }
 0x2a5   :  { %945 = vmatpush.xpose.msk.msrb.mxu2 %vm65_vm1, %v372_v61 }
 0x2ac   :  { %942 = vmatmul.msk.f32.vlgmr.msra.gmra.mxu2 %vm65_vm1, %v267_v0 }
 0x2ad   :  { %949 = vmatpush.xpose.msk.msra.mxu2 %vm65_vm1, %v474_v63 }
 0x2b4   :  { %946 = vmatmul.msk.f32.vlgmr.msrb.gmra.mxu2 %vm65_vm1, %v370_v1 }
 0x2b5   :  { %647 = vmatpush.msrb.mxu2 %v29_v3 }
 0x2bc   :  { %950 = vmatmul.msk.f32.vlgmr.msra.gmra.mxu2 %vm65_vm1, %v1112_v36 }
 0x2bd   :  { %772 = vmatpush.msra.mxu2 %v30_v46 }
 0x319   :  { %v138_v4 = vpop.f32.mrf.mxu2 }
 0x31a   :  { %940 = vmatmul.msk.f32.vlgmr.msrb.gmra.mxu3 %vm65_vm1, %v138_v4 }
 0x327   :  { %v217_v5 = vpop.f32.mrf.mxu2 }
 0x328   :  { %939 = vmatmul.msk.f32.vlgmr.msrb.gmra.mxu1 %vm65_vm1, %v217_v5 }
 0x32f   :  { %v291_v6 = vpop.f32.mrf.mxu2 }
 0x330   :  { %v294_v7 = vmul.f32 0.35355338, %v291_v6 }
 0x332   :  { %v295_v8 = vsel %vm65_vm1, %v294_v7, -inf }
 0x333   :  { %296 = vmax.xlane.f32.xlu2 %v295_v8 }
 0x337   :  { %v394_v9 = vpop.f32.mrf.mxu2 }
 0x338   :  { %v397_v10 = vmul.f32 0.35355338, %v394_v9 }
 0x33a   :  { %v398_v11 = vsel %vm65_vm1, %v397_v10, -inf }
 0x33b   :  { %399 = vmax.xlane.f32.xlu1 %v398_v11 }
 0x33f   :  { %v496_v12 = vpop.f32.mrf.mxu2 }
 0x340   :  { %v499_v14 = vmul.f32 0.35355338, %v496_v12 }
 0x342   :  { %v500_v15 = vsel %vm65_vm1, %v499_v14, -inf }
 0x343   :  { %501 = vmax.xlane.f32.xlu0 %v500_v15 }
 0x357   :  { %319 = vrot.lane.b32.xlu0 %v1081_v13, %s1018_s24 }
 0x35f   :  { %552 = vrot.lane.b32.xlu0 %v1112_v36, %s1013_s14 }
 0x367   :  { %550 = vrot.lane.b32.xlu0 %v1112_v36, %s1010_s12 }
 0x36f   :  { %780 = vrot.lane.b32.xlu0 %v1112_v36, %s1016_s0 }
 0x3a5   :  { %v240_v15 = vpop.f32.mrf.mxu1 }
 0x3a6   :  { %v297_v16 = vpop.xlane.xlu2 %296 }
 0x3a7   :  { %v298_v17 = vsub.f32 %v294_v7, %v297_v16 }
 0x3a9   :  { %v299_v18 = vmul.f32 1.442695, %v298_v17 }
 0x3ab   :  { %985 = vpow2.f32 %v299_v18 }
 0x3ae   :  { %v400_v19 = vpop.xlane.xlu1 %399 }
 0x3af   :  { %v401_v20 = vsub.f32 %v397_v10, %v400_v19 }
 0x3b1   :  { %v986_v21 = vpop.eup %985  ;;  %v402_v22 = vmul.f32 1.442695, %v401_v20 }
 0x3b2   :  { %v301_v23 = vsel %vm65_vm1, %v986_v21, 0.0 }
 0x3b3   :  { %987 = vpow2.f32 %v402_v22  ;;  %302 = vadd.xlane.f32.xlu2 %v301_v23 }
 0x3b6   :  { %v502_v24 = vpop.xlane.xlu0 %501 }
 0x3b7   :  { %v503_v25 = vsub.f32 %v499_v14, %v502_v24  ;;  %v1196_v14 = vld [vmem:[%s1255_s2 + $0x18] sm:$0xff]  ;;  %s1020_s2 = smov 32  }
 0x3b8   :  { %466 = vmatpush.msrb.mxu3 %v1196_v14 }
 0x3b9   :  { %v1156_v26 = vpop.eup %987  ;;  %v504_v27 = vmul.f32 1.442695, %v503_v25 }
 0x3ba   :  { %v404_v28 = vsel %vm65_vm1, %v1156_v26, 0.0 }
 0x3bb   :  { %989 = vpow2.f32 %v504_v27  ;;  %405 = vadd.xlane.f32.xlu1 %v404_v28 }
 0x3c1   :  { %v1160_v29 = vpop.eup %989 }
 0x3c2   :  { %v506_v30 = vsel %vm65_vm1, %v1160_v29, 0.0 }
 0x3c3   :  { %507 = vadd.xlane.f32.xlu2 %v506_v30 }
 0x3c9   :  { %v320_v31 = vpop.permute.xlu0 %319 }
 0x3ca   :  { %340 = vmatpush.msra.mxu1 %v320_v31 }
 0x3d1   :  { %v553_v52 = vpop.permute.xlu0 %552 }
 0x3d4   :  { %422 = vrot.lane.b32.xlu1 %v1081_v13, %s1019_s25 }
 0x3d9   :  { %v551_v3 = vpop.permute.xlu0 %550 }
 0x3db   :  { %524 = vrot.lane.b32.xlu2 %v1112_v36, %s1009_s11 }
 0x3dc   :  { %677 = vrot.lane.b32.xlu1 %v1112_v36, %s1015_s18 }
 0x3e1   :  { %v781_v12 = vpop.permute.xlu0 %780 }
 0x3e3   :  { %675 = vrot.lane.b32.xlu2 %v1112_v36, %s1014_s17 }
 0x3e4   :  { %778 = vrot.lane.b32.xlu1 %v1112_v36, %s1017_s19 }
 0x426   :  { %v303_v32 = vpop.xlane.xlu2 %302 }
 0x427   :  { %991 = vrcp.f32 %v303_v32  ;;  %v315_v13 = vand.u32 2147483648, %v303_v32  ;;  %v313_v39 = vand.u32 2147483647, %v303_v32  ;;  %vm309_vm11 = vweird.f32 %v303_v32 }
 0x429   :  { %v316_v42 = vor.u32 1.1754944e-38, %v315_v13  ;;  %vm314_vm13 = vcmp.eq.f32.partialorder %v313_v39, 8.507059e+37 }
 0x42d   :  { %v992_v33 = vpop.eup %991 }
 0x42e   :  { %v305_v34 = vmul.f32 %v992_v33, %v303_v32  ;;  %v406_v35 = vpop.xlane.xlu1 %405  ;;  %vm310_vm10 = vweird.f32 %v992_v33 }
 0x42f   :  { %993 = vrcp.f32 %v406_v35  ;;  %vm311_vm12 = vmor %vm309_vm11, %vm310_vm10  ;;  %v418_v55 = vand.u32 2147483648, %v406_v35  ;;  %vm412_vm15 = vweird.f32 %v406_v35  ;;  %v416_v56 = vand.u32 2147483647, %v406_v35 }
 0x430   :  { %v306_v37 = vsub.f32 1.0, %v305_v34 }
 0x431   :  { %v419_v60 = vor.u32 1.1754944e-38, %v418_v55  ;;  %vm417_vm3 = vcmp.eq.f32.partialorder %v416_v56, 8.507059e+37 }
 0x432   :  { %v307_v38 = vmul.f32 %v992_v33, %v306_v37 }
 0x434   :  { %v308_v40 = vadd.f32 %v992_v33, %v307_v38 }
 0x435   :  { %v994_v41 = vpop.eup %993 }
 0x436   :  { %v312_v43 = vsel %vm311_vm12, %v992_v33, %v308_v40  ;;  %v408_v44 = vmul.f32 %v994_v41, %v406_v35  ;;  %v508_v45 = vpop.xlane.xlu2 %507  ;;  %vm413_vm14 = vweird.f32 %v994_v41 }
 0x437   :  { %v317_v47 = vsel %vm314_vm13, %v316_v42, %v312_v43  ;;  %995 = vrcp.f32 %v508_v45  ;;  %vm414_vm2 = vmor %vm412_vm15, %vm413_vm14  ;;  %v520_v1 = vand.u32 2147483648, %v508_v45  ;;  %vm514_vm5 = vweird.f32 %v508_v45 }
 0x438   :  { %v409_v48 = vsub.f32 1.0, %v408_v44  ;;  %v1177_v49 = vmul.f32 %v986_v21, %v317_v47  ;;  %v518_v4 = vand.u32 2147483647, %v508_v45  ;;  %v263_v21 = vpop.f32.mrf.mxu3 }
 0x439   :  { %v521_v9 = vor.u32 1.1754944e-38, %v520_v1  ;;  %v264_v23 = vadd.f32 %v263_v21, %v240_v15 }
 0x43a   :  { %v410_v51 = vmul.f32 %v994_v41, %v409_v48  ;;  %943 = vmatmul.msk.f32.vlgmr.msra.gmra.mxu1 %vm65_vm1, %v1177_v49  ;;  %vm519_vm7 = vcmp.eq.f32.partialorder %v518_v4, 8.507059e+37 }
 0x43c   :  { %v411_v53 = vadd.f32 %v994_v41, %v410_v51 }
 0x43d   :  { %v996_v54 = vpop.eup %995 }
 0x43e   :  { %v510_v57 = vmul.f32 %v996_v54, %v508_v45  ;;  %v415_v58 = vsel %vm414_vm2, %v994_v41, %v411_v53  ;;  %vm515_vm4 = vweird.f32 %v996_v54  ;;  %v525_v8 = vpop.permute.xlu2 %524 }
 0x43f   :  { %v420_v63 = vsel %vm417_vm3, %v419_v60, %v415_v58  ;;  %vm516_vm6 = vmor %vm514_vm5, %vm515_vm4 }
 0x440   :  { %v511_v59 = vsub.f32 1.0, %v510_v57  ;;  %v1182_v6 = vmul.f32 %v1156_v26, %v420_v63 }
 0x442   :  { %v512_v61 = vmul.f32 %v996_v54, %v511_v59 }
 0x444   :  { %v513_v0 = vadd.f32 %v996_v54, %v512_v61 }
 0x446   :  { %v423_v5 = vpop.permute.xlu1 %422  ;;  %v517_v7 = vsel %vm516_vm6, %v996_v54, %v513_v0  ;;  %v676_v19 = vpop.permute.xlu2 %675  ;;  %vm909_vm6 = vcmask 261120  }
 0x447   :  { %443 = vmatpush.msrb.mxu1 %v423_v5  ;;  %v522_v10 = vsel %vm519_vm7, %v521_v9, %v517_v7  ;;  %vm911_vm7 = vcmask 523264  }
 0x448   :  { %947 = vmatmul.msk.f32.vlgmr.msrb.gmra.mxu1 %vm65_vm1, %v1182_v6  ;;  %v1188_v11 = vmul.f32 %v1160_v29, %v522_v10 }
 0x449   :  { %545 = vmatpush.msra.mxu1 %v525_v8 }
 0x44b   :  { %670 = vmatpush.msrb.mxu1 %v1136_v2 }
 0x44e   :  { %v678_v17 = vpop.permute.xlu1 %677 }
 0x450   :  { %951 = vmatmul.msk.f32.vlgmr.msra.gmra.mxu1 %vm65_vm1, %v1188_v11 }
 0x451   :  { %961 = vmatpush.xpose.msk.msra.mxu1 %vm65_vm1, %v781_v12 }
 0x456   :  { %v779_v20 = vpop.permute.xlu1 %778 }
 0x4b7   :  { %v342_v16 = vpop.f32.mrf.mxu1 }
 0x4b8   :  { %944 = vmatmul.msk.f32.vlgmr.msra.gmra.mxu3 %vm65_vm1, %v342_v16 }
 0x4b9   :  { %952 = vmatpush.xpose.msk.msra.mxu3 %vm65_vm1, %v553_v52 }
 0x4c5   :  { %v445_v2 = vpop.f32.mrf.mxu1 }
 0x4c6   :  { %948 = vmatmul.msk.f32.vlgmr.msrb.gmra.mxu3 %vm65_vm1, %v445_v2 }
 0x4c7   :  { %957 = vmatpush.xpose.msk.msrb.mxu3 %vm65_vm1, %v678_v17 }
 0x4cd   :  { %v547_v18 = vpop.f32.mrf.mxu1 }
 0x4ce   :  { %953 = vmatmul.msk.f32.vlgmr.msra.gmra.mxu3 %vm65_vm1, %v551_v3  ;;  %956 = vmatmul.msk.f32.vlgmr.msrb.gmra.mxu1 %vm65_vm1, %v547_v18 }
 0x4d6   :  { %958 = vmatmul.msk.f32.vlgmr.msrb.gmra.mxu3 %vm65_vm1, %v676_v19  ;;  %962 = vmatmul.msk.f32.vlgmr.msra.gmra.mxu1 %vm65_vm1, %v779_v20 }
 0x53b   :  { %v365_v22 = vpop.f32.mrf.mxu3 }
 0x53c   :  { %v368_v24 = vadd.f32 %v365_v22, %v264_v23 }
 0x549   :  { %v468_v25 = vpop.f32.mrf.mxu3 }
 0x54a   :  { %v1207_v26 = vadd.f32 %v468_v25, %v368_v24 }
 0x54b   :  { %v1209_v27 = vpop.f32.mrf.mxu1 }
 0x551   :  { %v575_v28 = vpop.f32.mrf.mxu3 }
 0x552   :  { %v578_v29 = vmul.f32 0.35355338, %v575_v28 }
 0x553   :  { %v803_v30 = vpop.f32.mrf.mxu1 }
 0x554   :  { %v806_v31 = vmul.f32 0.35355338, %v803_v30  ;;  %v579_v32 = vsel %vm65_vm1, %v578_v29, -inf }
 0x555   :  { %580 = vmax.xlane.f32.xlu2 %v579_v32 }
 0x556   :  { %v807_v33 = vsel %vm65_vm1, %v806_v31, -inf }
 0x557   :  { %808 = vmax.xlane.f32.xlu1 %v807_v33 }
 0x559   :  { %v700_v34 = vpop.f32.mrf.mxu3 }
 0x55a   :  { %v703_v35 = vmul.f32 0.35355338, %v700_v34 }
 0x55c   :  { %v704_v37 = vsel %vm65_vm1, %v703_v35, -inf }
 0x55d   :  { %705 = vmax.xlane.f32.xlu0 %v704_v37 }
 0x5c8   :  { %v581_v13 = vpop.xlane.xlu2 %580 }
 0x5c9   :  { %v582_v38 = vsub.f32 %v578_v29, %v581_v13 }
 0x5ca   :  { %v809_v39 = vpop.xlane.xlu1 %808 }
 0x5cb   :  { %v583_v40 = vmul.f32 1.442695, %v582_v38  ;;  %v810_v41 = vsub.f32 %v806_v31, %v809_v39 }
 0x5cd   :  { %997 = vpow2.f32 %v583_v40  ;;  %v811_v42 = vmul.f32 1.442695, %v810_v41 }
 0x5cf   :  { %999 = vpow2.f32 %v811_v42 }
 0x5d0   :  { %v706_v43 = vpop.xlane.xlu0 %705 }
 0x5d1   :  { %v707_v44 = vsub.f32 %v703_v35, %v706_v43 }
 0x5d3   :  { %v998_v45 = vpop.eup %997  ;;  %v708_v46 = vmul.f32 1.442695, %v707_v44 }
 0x5d4   :  { %v585_v47 = vsel %vm65_vm1, %v998_v45, 0.0 }
 0x5d5   :  { %v1000_v48 = vpop.eup %999  ;;  %1001 = vpow2.f32 %v708_v46  ;;  %586 = vadd.xlane.f32.xlu2 %v585_v47 }
 0x5d6   :  { %v813_v51 = vsel %vm65_vm1, %v1000_v48, 0.0 }
 0x5d7   :  { %814 = vadd.xlane.f32.xlu1 %v813_v51 }
 0x5db   :  { %v1216_v52 = vpop.eup %1001 }
 0x5dc   :  { %v710_v53 = vsel %vm65_vm1, %v1216_v52, 0.0 }
 0x5dd   :  { %711 = vadd.xlane.f32.xlu0 %v710_v53 }
 0x5ed   :  { %603 = vrot.lane.b32.xlu2 %v1112_v36, %s1012_s13 }
 0x5f0   :  { %831 = vrot.lane.b32.xlu1 %v1112_v36, %s1019_s25 }
 0x5f1   :  { %728 = vrot.lane.b32.xlu0 %v1112_v36, %s1018_s24 }
 0x5f5   :  { %885 = vrot.lane.b32.xlu2 %v1118_v50, %s1009_s11 }
 0x5f8   :  { %888 = vrot.lane.b32.xlu1 %v1123_v62, %s1016_s0 }
 0x5f9   :  { %891 = vrot.lane.b32.xlu0 %v1177_v49, %s1015_s18 }
 0x5fd   :  { %894 = vrot.lane.b32.xlu2 %v1182_v6, %s1013_s14 }
 0x600   :  { %897 = vrot.lane.b32.xlu1 %v1188_v11, %s1011_s1 }
 0x648   :  { %v587_v54 = vpop.xlane.xlu2 %586 }
 0x649   :  { %1003 = vrcp.f32 %v587_v54  ;;  %v597_v49 = vand.u32 2147483647, %v587_v54  ;;  %v599_v60 = vand.u32 2147483648, %v587_v54  ;;  %vm593_vm9 = vweird.f32 %v587_v54 }
 0x64a   :  { %v815_v55 = vpop.xlane.xlu1 %814 }
 0x64b   :  { %1005 = vrcp.f32 %v815_v55  ;;  %v827_v0 = vand.u32 2147483648, %v815_v55  ;;  %v825_v4 = vand.u32 2147483647, %v815_v55  ;;  %vm598_vm12 = vcmp.eq.f32.partialorder %v597_v49, 8.507059e+37 }
 0x64c   :  { %v600_v6 = vor.u32 1.1754944e-38, %v599_v60  ;;  %vm821_vm13 = vweird.f32 %v815_v55 }
 0x64d   :  { %v828_v10 = vor.u32 1.1754944e-38, %v827_v0  ;;  %vm826_vm15 = vcmp.eq.f32.partialorder %v825_v4, 8.507059e+37 }
 0x64f   :  { %v1004_v36 = vpop.eup %1003 }
 0x650   :  { %v589_v56 = vmul.f32 %v1004_v36, %v587_v54  ;;  %v712_v57 = vpop.xlane.xlu0 %711  ;;  %v604_v50 = vpop.permute.xlu2 %603  ;;  %vm594_vm8 = vweird.f32 %v1004_v36 }
 0x651   :  { %v1006_v58 = vpop.eup %1005  ;;  %1007 = vrcp.f32 %v712_v57  ;;  %624 = vmatpush.msrb.mxu0 %v604_v50  ;;  %vm595_vm11 = vmor %vm593_vm9, %vm594_vm8  ;;  %v724_v2 = vand.u32 2147483648, %v712_v57  ;;  %v722_v20 = vand.u32 2147483647, %v712_v57  ;;  %vm718_vm3 = vweird.f32 %v712_v57 }
 0x652   :  { %v590_v62 = vsub.f32 1.0, %v589_v56  ;;  %v817_v59 = vmul.f32 %v1006_v58, %v815_v55  ;;  %vm822_vm10 = vweird.f32 %v1006_v58  ;;  %vm913_vm8 = vcmask 588800  }
 0x653   :  { %vm823_vm14 = vmor %vm821_vm13, %vm822_vm10  ;;  %v725_v22 = vor.u32 1.1754944e-38, %v724_v2  ;;  %vm723_vm5 = vcmp.eq.f32.partialorder %v722_v20, 8.507059e+37  ;;  %vm917_vm9 = vcmask 719872   ;;  %vm920_vm10 = vcmask 850944  }
 0x654   :  { %v591_v61 = vmul.f32 %v1004_v36, %v590_v62  ;;  %v818_v63 = vsub.f32 1.0, %v817_v59 }
 0x656   :  { %v592_v1 = vadd.f32 %v1004_v36, %v591_v61  ;;  %v819_v3 = vmul.f32 %v1006_v58, %v818_v63 }
 0x657   :  { %v1008_v5 = vpop.eup %1007 }
 0x658   :  { %v714_v7 = vmul.f32 %v1008_v5, %v712_v57  ;;  %v596_v8 = vsel %vm595_vm11, %v1004_v36, %v592_v1  ;;  %v820_v9 = vadd.f32 %v1006_v58, %v819_v3  ;;  %vm719_vm2 = vweird.f32 %v1008_v5 }
 0x659   :  { %v601_v11 = vsel %vm598_vm12, %v600_v6, %v596_v8  ;;  %vm720_vm4 = vmor %vm718_vm3, %vm719_vm2  ;;  %vm922_vm11 = vcmask 916480   ;;  %vm924_vm12 = vcmask 982016  }
 0x65a   :  { %v715_v12 = vsub.f32 1.0, %v714_v7  ;;  %v602_v15 = vmul.f32 %v998_v45, %v601_v11  ;;  %v824_v16 = vsel %vm823_vm14, %v1006_v58, %v820_v9 }
 0x65b   :  { %v829_v17 = vsel %vm826_vm15, %v828_v10, %v824_v16 }
 0x65c   :  { %v716_v18 = vmul.f32 %v1008_v5, %v715_v12  ;;  %954 = vmatmul.msk.f32.vlgmr.msrb.gmra.mxu0 %vm65_vm1, %v602_v15  ;;  %v830_v19 = vmul.f32 %v1000_v48, %v829_v17 }
 0x65e   :  { %906 = vrot.lane.b32.xlu1 %v830_v19, %s1010_s12  ;;  %v717_v21 = vadd.f32 %v1008_v5, %v716_v18 }
 0x660   :  { %v721_v23 = vsel %vm720_vm4, %v1008_v5, %v717_v21 }
 0x661   :  { %v726_v24 = vsel %vm723_vm5, %v725_v22, %v721_v23 }
 0x662   :  { %v832_v25 = vpop.permute.xlu1 %831  ;;  %v727_v28 = vmul.f32 %v1216_v52, %v726_v24 }
 0x663   :  { %852 = vmatpush.msra.mxu3 %v832_v25  ;;  %v729_v29 = vpop.permute.xlu0 %728 }
 0x664   :  { %963 = vmatmul.msk.f32.vlgmr.msra.gmra.mxu3 %vm65_vm1, %v830_v19  ;;  %903 = vrot.lane.b32.xlu2 %v727_v28, %s1014_s17 }
 0x665   :  { %749 = vmatpush.msra.mxu0 %v729_v29 }
 0x666   :  { %959 = vmatmul.msk.f32.vlgmr.msra.gmra.mxu0 %vm65_vm1, %v727_v28 }
 0x667   :  { %875 = vmatpush.msrb.mxu0 %v1196_v14  ;;  %v886_v14 = vpop.permute.xlu2 %885 }
 0x66a   :  { %v889_v39 = vpop.permute.xlu1 %888 }
 0x66b   :  { %v892_v40 = vpop.permute.xlu0 %891 }
 0x66f   :  { %v895_v42 = vpop.permute.xlu2 %894 }
 0x6be   :  { %v904_v52 = vpop.permute.xlu2 %903 }
 0x6d9   :  { %v626_v30 = vpop.f32.mrf.mxu0 }
 0x6da   :  { %955 = vmatmul.msk.f32.vlgmr.msrb.gmra.mxu2 %vm65_vm1, %v626_v30 }
 0x6e3   :  { %v751_v31 = vpop.f32.mrf.mxu0 }
 0x6e4   :  { %960 = vmatmul.msk.f32.vlgmr.msra.gmra.mxu2 %vm65_vm1, %v751_v31 }
 0x6e7   :  { %v854_v32 = vpop.f32.mrf.mxu3 }
 0x6e8   :  { %964 = vmatmul.msk.f32.vlgmr.msrb.gmra.mxu0 %vm65_vm1, %v854_v32  ;;  %vm915_vm1 = vcmask 654336  }
 0x75d   :  { %v649_v33 = vpop.f32.mrf.mxu2 }
 0x75e   :  { %v673_v34 = vadd.f32 %v1209_v27, %v649_v33  ;;  %v898_v27 = vpop.permute.xlu1 %897 }
 0x765   :  { %v877_v13 = vpop.f32.mrf.mxu0 }
 0x766   :  { %v907_v54 = vpop.permute.xlu1 %906 }
 0x767   :  { %v774_v35 = vpop.f32.mrf.mxu2 }
 0x768   :  { %v777_v37 = vadd.f32 %v774_v35, %v673_v34 }
 0x76a   :  { %v880_v38 = vadd.f32 %v877_v13, %v777_v37 }
 0x76c   :  { %882 = vrot.lane.b32.xlu0 %v880_v38, %s1020_s2 }
 0x774   :  { %900 = vrot.lane.b32.xlu0 %v602_v15, %s1017_s19 }
 0x7de   :  { %v883_v41 = vpop.permute.xlu0 %882 }
 0x7df   :  { %v910_v43 = vsel %vm909_vm6, %v1207_v26, %v883_v41 }
 0x7e0   :  { %v912_v44 = vsel %vm911_vm7, %v910_v43, %v886_v14 }
 0x7e1   :  { %v914_v45 = vsel %vm913_vm8, %v912_v44, %v889_v39 }
 0x7e2   :  { %v916_v46 = vsel %vm915_vm1, %v914_v45, %v892_v40 }
 0x7e3   :  { %v918_v47 = vsel %vm917_vm9, %v916_v46, %v895_v42 }
 0x7e4   :  { %v919_v51 = vsel %vm32_vm0, %v918_v47, %v898_v27 }
 0x7e6   :  { %v901_v48 = vpop.permute.xlu0 %900 }
 0x7e7   :  { %v921_v53 = vsel %vm920_vm10, %v919_v51, %v901_v48 }
 0x7e8   :  { %v923_v55 = vsel %vm922_vm11, %v921_v53, %v904_v52 }
 0x7e9   :  { %v925_v36 = vsel %vm924_vm12, %v923_v55, %v907_v54 }
 0x7ea   :  { %926 = vst [vmem:[%s1256_s3] sm:$0xff] %v925_v36 }

</bundles_post_ra>
